<compile_context>
chip_gen: v6e
topology: v6e:2x2x1
jax: 0.10.0
libtpu: 0.0.40
codegen_flags: <defaults>
</compile_context>

<pallas_src>
import math
import jax
import jax.numpy as jnp
from jax import lax
from jax.experimental import pallas as pl
from jax.experimental.pallas import tpu as pltpu


def _round_up(x: int, m: int) -> int:
    return ((x + m - 1) // m) * m


def _cdiv(a: int, b: int) -> int:
    return -(-a // b)


def _balanced_tile(dim: int, tile_max: int, align: int) -> int:
    """Largest aligned tile <= tile_max that keeps padding waste small."""
    dim_a = _round_up(dim, align)
    if dim_a <= tile_max:
        return dim_a
    n_blocks = _cdiv(dim_a, tile_max)
    return _round_up(_cdiv(dim, n_blocks), align)


# ---------------------------------------------------------------------------
# Kernels
# ---------------------------------------------------------------------------
_DIMNUMS = (((1,), (1,)), ((), ()))  # contract dim 1 of x with dim 1 of weight


def _delayed_linear_kernel_single_k(x_ref, w_ref, b_ref, o_ref):
    # x_ref: (tm, K)  w_ref: (tn, K)  b_ref: (1, tn)  o_ref: (tm, tn)
    z = lax.dot_general(
        x_ref[...], w_ref[...],
        dimension_numbers=_DIMNUMS,
        preferred_element_type=jnp.float32,
    )
    z = z + b_ref[...]
    o_ref[...] = jnp.maximum(z, 0.0).astype(o_ref.dtype)  # non_lin = ReLU


def _delayed_linear_kernel_multi_k(x_ref, w_ref, b_ref, o_ref, acc_ref):
    # x_ref: (tm, tk)  w_ref: (tn, tk)  b_ref: (1, tn)  o_ref: (tm, tn)
    k = pl.program_id(2)

    @pl.when(k == 0)
    def _():
        acc_ref[...] = jnp.zeros_like(acc_ref)

    acc_ref[...] += lax.dot_general(
        x_ref[...], w_ref[...],
        dimension_numbers=_DIMNUMS,
        preferred_element_type=jnp.float32,
    )

    @pl.when(k == pl.num_programs(2) - 1)
    def _():
        z = acc_ref[...] + b_ref[...]
        o_ref[...] = jnp.maximum(z, 0.0).astype(o_ref.dtype)  # non_lin = ReLU


# ---------------------------------------------------------------------------
# Wrapper
# ---------------------------------------------------------------------------
def delayed_linear_forward(
    x, weight, bias, *,
    tm_max=1024, tn_max=512,
    tk_single_max=1024, tk_multi=512,
    vmem_budget_bytes=14 * 1024 * 1024,
    cast_inputs_to_bf16=False,
):
    """x: (T, D_in), weight: (D_out, D_in), bias: (1, D_out) -> (T, D_out)."""
    T, D_in = x.shape
    D_out = weight.shape[0]

    # --- contraction tiling: single block if K is small, else accumulate ----
    K_p = _round_up(D_in, 128)
    single_k = K_p <= tk_single_max
    tk = K_p if single_k else tk_multi
    K_p = _round_up(D_in, tk)

    # --- output tiling: big, padding-balanced tiles -------------------------
    tm = _balanced_tile(T, tm_max, 8)
    tn = _balanced_tile(D_out, tn_max, 128)

    # Expose >= 2 parallel blocks so v7x's second TensorCore isn't idle.
    if _cdiv(T, tm) * _cdiv(D_out, tn) == 1 and T > 8:
        tm = max(8, _round_up(_cdiv(T, 2), 8))

    # Keep the double-buffered VMEM working set inside the scoped budget
    # (safe for v5e 16 MiB default, v6e 32 MiB, v7x 32/64 MiB).
    def _footprint(tm_, tn_):
        words = 2 * tm_ * tk + 2 * tn_ * tk + 2 * tm_ * tn_ + 2 * tn_
        if not single_k:
            words += tm_ * tn_  # f32 accumulator scratch
        return words * 4

    while _footprint(tm, tn) > vmem_budget_bytes:
        if tm > 256:
            tm = _round_up(tm // 2, 8)
        elif tn > 128:
            tn = _round_up(tn // 2, 128)
        else:
            break

    T_p = _round_up(T, tm)
    N_p = _round_up(D_out, tn)

    in_dtype = jnp.bfloat16 if cast_inputs_to_bf16 else x.dtype
    x_p = jnp.pad(x, ((0, T_p - T), (0, K_p - D_in))).astype(in_dtype)
    # Weight kept in PyTorch (D_out, D_in) layout -- no per-call transpose.
    w_p = jnp.pad(weight, ((0, N_p - D_out), (0, K_p - D_in))).astype(in_dtype)
    b_p = jnp.pad(bias, ((0, 0), (0, N_p - D_out))).astype(jnp.float32)

    cost = pl.CostEstimate(
        flops=2 * T_p * K_p * N_p,
        bytes_accessed=4 * (T_p * K_p + K_p * N_p + T_p * N_p),
        transcendentals=0,
    )

    if single_k:
        grid = (T_p // tm, N_p // tn)
        out_p = pl.pallas_call(
            _delayed_linear_kernel_single_k,
            out_shape=jax.ShapeDtypeStruct((T_p, N_p), x.dtype),
            grid=grid,
            in_specs=[
                pl.BlockSpec((tm, tk), lambda i, j: (i, 0)),   # x tile
                pl.BlockSpec((tn, tk), lambda i, j: (j, 0)),   # weight tile
                pl.BlockSpec((1, tn), lambda i, j: (0, j)),    # bias tile
            ],
            out_specs=pl.BlockSpec((tm, tn), lambda i, j: (i, j)),
            compiler_params=pltpu.CompilerParams(
                dimension_semantics=("parallel", "parallel"),
            ),
            cost_estimate=cost,
        )(x_p, w_p, b_p)
    else:
        grid = (T_p // tm, N_p // tn, K_p // tk)
        out_p = pl.pallas_call(
            _delayed_linear_kernel_multi_k,
            out_shape=jax.ShapeDtypeStruct((T_p, N_p), x.dtype),
            grid=grid,
            in_specs=[
                pl.BlockSpec((tm, tk), lambda i, j, k: (i, k)),   # x tile
                pl.BlockSpec((tn, tk), lambda i, j, k: (j, k)),   # weight tile
                pl.BlockSpec((1, tn), lambda i, j, k: (0, j)),    # bias tile
            ],
            out_specs=pl.BlockSpec((tm, tn), lambda i, j, k: (i, j)),
            scratch_shapes=[pltpu.VMEM((tm, tn), jnp.float32)],
            compiler_params=pltpu.CompilerParams(
                dimension_semantics=("parallel", "parallel", "arbitrary"),
            ),
            cost_estimate=cost,
        )(x_p, w_p, b_p)

    return out_p[:T, :D_out]


def _xavier_uniform(key, shape):
    # nn.init.xavier_uniform_: U(-a, a), a = sqrt(6 / (fan_in + fan_out))
    fan_out, fan_in = shape
    a = math.sqrt(6.0 / (fan_in + fan_out))
    return jax.random.uniform(key, shape, jnp.float32, minval=-a, maxval=a)


if __name__ == "__main__":
    key = jax.random.PRNGKey(0)

    # e_trace_mat / delta_mat / sparse_inputs only affect the backward pass.
    # (T, D_in, D_out, kwargs-to-force-a-particular-tiling-path)
    cases = [
        (16, 64, 32, {}),                                    # tiny, single-K
        (300, 96, 200, {}),                                  # ragged, v7x M-split
        (64, 256, 160, dict(tk_single_max=128, tk_multi=128)),  # multi-K path
    ]

    for idx, (T, D_in, D_out, kw) in enumerate(cases):
        k_x, k_w, k_b, key = jax.random.split(key, 4)
        x = jax.random.normal(k_x, (T, D_in), jnp.float32)
        weight = _xavier_uniform(k_w, (D_out, D_in))   # (out_features, in_features)
        bias = _xavier_uniform(k_b, (1, D_out))        # (1, out_features)

        out = delayed_linear_forward(x, weight, bias, **kw)
        out = jax.block_until_ready(out)

        # Pure-JAX reference check of the forward semantics.
        ref = jnp.maximum(
            jnp.matmul(x, weight.T, precision=lax.Precision.HIGHEST) + bias, 0.0
        )
        assert out.shape == (T, D_out), f"case {idx}: bad shape {out.shape}"
        assert jnp.allclose(out, ref, atol=2e-5, rtol=2e-5), f"case {idx}: mismatch"

    print("KERNEL_OK")
</pallas_src>

<mosaic_0001>
module attributes {stable_mosaic.version = 11 : i64} {
  func.func @_delayed_linear_kernel_single_k(%arg0: i32, %arg1: i32, %arg2: memref<8x128xf32, #tpu.memory_space<vmem>>, %arg3: memref<128x128xf32, #tpu.memory_space<vmem>>, %arg4: memref<1x128xf32, #tpu.memory_space<vmem>>, %arg5: memref<8x128xf32, #tpu.memory_space<vmem>>) attributes {dimension_semantics = [#tpu.dimension_semantics<parallel>, #tpu.dimension_semantics<parallel>], iteration_bounds = array<i64: 2, 1>, scalar_prefetch = 0 : i64, scratch_operands = 0 : i64, tpu.core_type = #tpu.core_type<tc>, window_params = [{transform_indices = @transform_0, window_bounds = array<i64: 8, 128>}, {transform_indices = @transform_1, window_bounds = array<i64: 128, 128>}, {transform_indices = @transform_2, window_bounds = array<i64: 1, 128>}, {transform_indices = @transform_3, window_bounds = array<i64: 8, 128>}]} {
    %c0 = arith.constant 0 : index
    %c0_0 = arith.constant 0 : index
    %0 = vector.load %arg2[%c0, %c0_0] : memref<8x128xf32, #tpu.memory_space<vmem>>, vector<8x128xf32>
    %c0_1 = arith.constant 0 : index
    %c0_2 = arith.constant 0 : index
    %1 = vector.load %arg3[%c0_1, %c0_2] : memref<128x128xf32, #tpu.memory_space<vmem>>, vector<128x128xf32>
    %cst = arith.constant dense<0.000000e+00> : vector<8x128xf32>
    %2 = tpu.matmul %0, %1, %cst {dimension_numbers = #tpu.dot_dimension_numbers<[1], [1], [0], [0], [0, 0, 1, 0], [], []>} : vector<8x128xf32>, vector<128x128xf32>, vector<8x128xf32> -> vector<8x128xf32>
    %c0_3 = arith.constant 0 : index
    %c0_4 = arith.constant 0 : index
    %3 = vector.load %arg4[%c0_3, %c0_4] : memref<1x128xf32, #tpu.memory_space<vmem>>, vector<1x128xf32>
    %4 = vector.broadcast %3 : vector<1x128xf32> to vector<8x128xf32>
    %5 = arith.addf %2, %4 : vector<8x128xf32>
    %cst_5 = arith.constant 0.000000e+00 : f32
    %6 = vector.broadcast %cst_5 : f32 to vector<8x128xf32>
    %7 = arith.maximumf %5, %6 : vector<8x128xf32>
    %c0_6 = arith.constant 0 : index
    %c0_7 = arith.constant 0 : index
    %8 = vector.load %arg5[%c0_6, %c0_7] : memref<8x128xf32, #tpu.memory_space<vmem>>, vector<8x128xf32>
    tpu.vector_store %arg5[%c0_6, %c0_7], %7 {strides = array<i32>} : memref<8x128xf32, #tpu.memory_space<vmem>>, vector<8x128xf32>,
    return
  }
  func.func @transform_0(%arg0: i32, %arg1: i32) -> (i32, i32) {
    %c0_i32 = arith.constant 0 : i32
    %c0_i32_0 = arith.constant 0 : i32
    return %arg0, %c0_i32 : i32, i32
  }
  func.func @transform_1(%arg0: i32, %arg1: i32) -> (i32, i32) {
    %c0_i32 = arith.constant 0 : i32
    %c0_i32_0 = arith.constant 0 : i32
    return %arg1, %c0_i32 : i32, i32
  }
  func.func @transform_2(%arg0: i32, %arg1: i32) -> (i32, i32) {
    %c0_i32 = arith.constant 0 : i32
    %c0_i32_0 = arith.constant 0 : i32
    return %c0_i32, %arg1 : i32, i32
  }
  func.func @transform_3(%arg0: i32, %arg1: i32) -> (i32, i32) {
    %c0_i32 = arith.constant 0 : i32
    return %arg0, %arg1 : i32, i32
  }
}

</mosaic_0001>

<bundles_post_ra>
// kernel: tpu_custom_call.1
= control target key start
LH: loop header
LB: loop body
LE: loop exit
PB: predicated region body
PF: predicated region fallthrough
CT: control target
= control target key end

     0   :  { %8 = vsyncpa [#allocation3], 0  ;;  %s942_s0 = inlined_call_operand.hbm [shape: f32[16,128], index: 0, kind: input, shape index: {}]   ;;  %s943_s1 = inlined_call_operand.hbm [shape: f32[128,128], index: 1, kind: input, shape index: {}]   ;;  %s944_s2 = inlined_call_operand.vmem [shape: f32[1,128], index: 2, kind: input, shape index: {}]   ;;  %s945_s3 = inlined_call_operand.hbm [shape: f32[16,128], index: 3, kind: output, shape index: {}]  }
   0x1   :  { %10 = vsyncpa [#allocation3 + $0x1], 0 }
   0x2   :  { %11 = vsyncpa [#allocation6], 0 }
   0x3   :  { %12 = vsyncpa [#allocation4], 0 }
   0x4   :  { %14 = vsyncpa [#allocation4 + $0x1], 0  ;;  %s765_s12 = smov 0   ;;  %s767_s13 = smov 0  }
   0x5   :  { %s769_s14 = smov 0   ;;  %s771_s15 = smov 0  }
   0x6   :  { %s773_s16 = smov 0   ;;  %s775_s17 = smov 0  }
   0x7 LB: > { %s452_s18 = sadd.s32 4294967295, %s736_s17   ;;  %s453_s19 = sadd.s32 4294967294, %s736_s17   ;;  %s736_s17 = sphi %s775_s17, %s20_s17   ;;  %s732_s16 = sphi %s773_s16, %s963_s16   ;;  %s728_s15 = sphi %s771_s15, %s962_s15   ;;  %s724_s14 = sphi %s769_s14, %s961_s14   ;;  %s720_s13 = sphi %s767_s13, %s960_s13   ;;  %s716_s12 = sphi %s765_s12, %s959_s12  }
   0x8   : > { %p52_p0 = scmp.ne.s32.totalorder %s720_s13, %s716_s12  ;;  %p799_p1 = scmp.eq.s32.totalorder %s452_s18, 0 }
   0x9   : > { %p803_p2 = scmp.eq.s32.totalorder %s452_s18, 1  ;;  %p136_p3 = scmp.eq.s32.totalorder %s453_s19, 1 }
   0xa   : > { %p809_p4 = por %p799_p1, %p52_p0  ;;  %p454_p5 = scmp.ge.s32.totalorder %s736_s17, 1 }
   0xb   : > { %p814_p6 = por %p136_p3, %p52_p0  ;;  %p143_p7 = scmp.lt.s32.totalorder %s736_s17, 3 }
   0xc   : > { %s949_s22 = scalar_select %p809_p4, 1, 0 }
   0xd   : > { %s950_s23 = scalar_select %p814_p6, 1, 0 }
   0xe   : > { %p819_p8 = pnand %p454_p5, %p143_p7  ;;  %s738_s25 = smov [#allocation5]  }
   0xf   : > { %s158_s26 = sshll.u32 %s738_s25, 4  ;;  %s32_s28 = sadd.s32 1, %s732_s16  ;;  %s159_s26 = int_to_ptr.vmem [resolvable:$true] %s158_s26 }
  0x10   : > { %p529_p9 = pneg %p819_p8  ;;  %s609_s29 = scalar_lea.vmem %s159_s26, 2048 }
  0x11   : > { %p610_p13 = scmp.ne.s32.totalorder %s159_s26, %s609_s29  ;;  %p617_p5 = scmp.lt.s32.totalorder %s159_s26, %s159_s26 }
  0x12   : > { %p828_p11 = pnand %p529_p9, %p799_p1  ;;  %p618_p7 = scmp.lt.s32.totalorder %s609_s29, %s609_s29 }
  0x14   : > { %p600_p12 = pneg %p828_p11  ;;  %p619_p6 = por %p618_p7, %p617_p5 }
  0x16   : > { %p612_p0 = pnand %p610_p13, %p600_p12 }
  0x18   : > { %p613_p3 = pneg %p612_p0 }
  0x1a   : > { %p620_p4 = pnand %p619_p6, %p613_p3 }
  0x1c   : > { %623 = shalt.err (!%p620_p4)
}
  0x1d   : > { %s739_s30 = smov 128   ;;  %s740_s4 = smov 8  }
  0x1e   : > { %532 = dma.hbm_to_vmem [thread:$0]  (!%p828_p11), %s943_s1, 2048, %s159_s26, [#allocation6], %s739_s30, %s739_s30, %s740_s4  }
  0x1f   : > { %p34_p6 = scmp.ge.s32.totalorder %s32_s28, 2  ;;  %s39_s7 = sadd.s32 1, %s724_s14 }
  0x20   : > { %p46_p4 = scmp.ne.s32.totalorder %s724_s14, %s720_s13  ;;  %p47_p9 = scmp.eq.s32.totalorder %s736_s17, 0 }
  0x21   : > { %s965_s28 = smov (%p34_p6, %s32_s28), 0  ;;  %p542_p0 = scmp.lt.s32.totalorder %s736_s17, 2 }
  0x22   : > { %p846_p12 = por %p47_p9, %p46_p4  ;;  %p852_p13 = por %p803_p2, %p46_p4 }
  0x23   : > { %s36_s10 = ssub.s32 %s732_s16, %s965_s28  ;;  %s178_s11 = sand.u32 1, %s724_s14  }
  0x24   : > { %p37_p11 = scmp.eq.s32.totalorder %s36_s10, 0  ;;  %s458_s18 = sshll.u32 %s178_s11, 3 }
  0x25   : > { %s459_s25 = sshll.u32 %s732_s16, 7  ;;  %s182_s30 = scalar_lea.vmem [#allocation2], %s458_s18 }
  0x26   : > { %s861_s19 = scalar_select %p37_p11, %s724_s14, %s39_s7  }
  0x27   : > { %s187_s29 = scalar_lea.hbm %s942_s0, %s459_s25  ;;  %s189_s4 = sshll.u32 %s182_s30, 4  ;;  %s190_s4 = int_to_ptr.vmem [resolvable:$true] %s189_s4 }
  0x28   : > { %p869_p2 = pnand %p542_p0, %p846_p12  ;;  %s179_s5 = scalar_lea.sflag [#allocation3], %s178_s11 }
  0x29   : > { %s637_s6 = scalar_lea.vmem %s190_s4, 128  ;;  %s741_s7 = smov [#allocation2]  }
  0x2a   : > { %p626_p3 = pneg %p869_p2  ;;  %p638_p5 = scmp.ne.s32.totalorder %s190_s4, %s637_s6 }
  0x2b   : > { %s642_s10 = sshll.u32 %s741_s7, 4  ;;  %s643_s10 = int_to_ptr.vmem [resolvable:$false] %s642_s10 }
  0x2c   : > { %p640_p7 = pnand %p638_p5, %p626_p3  ;;  %s644_s25 = scalar_lea.vmem %s643_s10, 256 }
  0x2d   : > { %p645_p4 = scmp.lt.s32.totalorder %s190_s4, %s643_s10  ;;  %p646_p9 = scmp.lt.s32.totalorder %s644_s25, %s637_s6 }
  0x2e   : > { %p641_p6 = pneg %p640_p7 }
  0x2f   : > { %p647_p11 = por %p646_p9, %p645_p4 }
  0x31   : > { %p648_p10 = pnand %p647_p11, %p641_p6 }
  0x33   : > { %651 = shalt.err (!%p648_p10)
}
  0x34   : > { %536 = dma.hbm_to_vmem [thread:$0]  (!%p869_p2), %s187_s29, 128, %s190_s4, %s179_s5  }
  0x35   : > { %198 = sbr.rel (%p819_p8) target bundleno = 336 (0x150), region = 32  ;;  %s880_s8 = sand.u32 (!%p819_p8), 1, %s720_s13  }
  0x36   : > { %s461_s11 = sshll.u32 (!%p819_p8), %s880_s8, 3  ;;  %s201_s18 = scalar_lea.sflag (!%p819_p8), [#allocation3], %s880_s8 }
  0x37   : > { %s886_s26 = scalar_lea.vmem (!%p819_p8), [#allocation2], %s461_s11  ;;  %p956_p12 = scmp.ne.s32.totalorder (!%p819_p8), %s949_s22, 0 }
  0x3a   : > { %703 = dma.done.wait (%p956_p12), %s201_s18, 128  }
  0x3b   : > { %705 = vsyncadd (%p956_p12), %s201_s18, 4294967168 }
  0x3c   : > { %707 = dma.done.wait (%p799_p1), [#allocation6], 2048  }
  0x3d   : > { %709 = vsyncadd (%p799_p1), [#allocation6], 4294965248  ;;  %v742_v0 = vmov 0.0   ;;  %vm743_vm0 = vmmov 0   ;;  %v254_v1 = vld [vmem:[#allocation5 + $0x78] sm:$0xff]  ;;  %v253_v2 = vld [vmem:[#allocation5 + $0x70] sm:$0xff] }
  0x3e   : > { %486 = vmatprep.subr.mxu0 %v742_v0  ;;  %518 = vmatprep.mubr.msk.f32.mxu0 %vm743_vm0, %v742_v0  ;;  %v252_v3 = vld [vmem:[#allocation5 + $0x68] sm:$0xff]  ;;  %v251_v4 = vld [vmem:[#allocation5 + $0x60] sm:$0xff]  ;;  %v250_v5 = vld [vmem:[#allocation5 + $0x58] sm:$0xff]  ;;  %s466_s24 = sshll.u32 %s728_s15, 7  ;;  %s233_s27 = scalar_lea.vmem [#allocation7], %s461_s11 }
  0x3f   : > { %487 = vmatpush3.xpose.msra.mxu0 %v254_v1  ;;  %v249_v6 = vld [vmem:[#allocation5 + $0x50] sm:$0xff]  ;;  %v248_v7 = vld [vmem:[#allocation5 + $0x48] sm:$0xff]  ;;  %v247_v8 = vld [vmem:[#allocation5 + $0x40] sm:$0xff]  ;;  %s349_s29 = sshll.u32 %s233_s27, 4  ;;  %s347_s21 = scalar_lea.hbm %s945_s3, %s466_s24  ;;  %s350_s29 = int_to_ptr.vmem [resolvable:$true] %s349_s29 }
  0x40   : > { %488 = vmatprep.subr.mxu0 %v742_v0  ;;  %v246_v9 = vld [vmem:[#allocation5 + $0x38] sm:$0xff]  ;;  %v245_v10 = vld [vmem:[#allocation5 + $0x30] sm:$0xff]  ;;  %v244_v11 = vld [vmem:[#allocation5 + $0x28] sm:$0xff]  ;;  %s335_s5 = scalar_lea.sflag [#allocation4], %s880_s8  ;;  %s652_s6 = scalar_lea.vmem %s350_s29, 128 }
  0x41   : > { %v243_v12 = vld [vmem:[#allocation5 + $0x20] sm:$0xff]  ;;  %v242_v13 = vld [vmem:[#allocation5 + $0x18] sm:$0xff]  ;;  %v241_v14 = vld [vmem:[#allocation5 + $0x10] sm:$0xff]  ;;  %p653_p1 = scmp.ne.s32.totalorder %s350_s29, %s652_s6  ;;  %s744_s7 = smov [#allocation7]  }
  0x42   : > { %v240_v15 = vld [vmem:[#allocation5 + $0x8] sm:$0xff]  ;;  %v239_v16 = vld [vmem:[#allocation5] sm:$0xff]  ;;  %v238_v17 = vld [vmem:[%s886_s26] sm:$0xff]  ;;  %s656_s15 = sshll.u32 %s744_s7, 4  ;;  %s657_s15 = int_to_ptr.vmem [resolvable:$false] %s656_s15 }
  0x43   : > { %489 = vmatpush3.xpose.msra.mxu0 %v253_v2  ;;  %v464_v18 = vld [vmem:[%s944_s2] ss:$0 sm:$0xff]  ;;  %p654_p8 = pnand %p653_p1, %p852_p13  ;;  %s658_s10 = scalar_lea.vmem %s657_s15, 256 }
  0x44   : > { %490 = vmatprep.subr.mxu0 %v742_v0  ;;  %p659_p0 = scmp.lt.s32.totalorder %s350_s29, %s657_s15  ;;  %p660_p2 = scmp.lt.s32.totalorder %s658_s10, %s652_s6 }
  0x45   : > { %p655_p10 = pneg %p654_p8 }
  0x46   : > { %p661_p3 = por %p660_p2, %p659_p0 }
  0x47   : > { %491 = vmatpush3.xpose.msra.mxu0 %v252_v3 }
  0x48   : > { %492 = vmatprep.subr.mxu0 %v742_v0  ;;  %p662_p5 = pnand %p661_p3, %p655_p10 }
  0x4b   : > { %493 = vmatpush3.xpose.msra.mxu0 %v251_v4 }
  0x4c   : > { %494 = vmatprep.subr.mxu0 %v742_v0 }
  0x4f   : > { %495 = vmatpush3.xpose.msra.mxu0 %v250_v5 }
  0x50   : > { %496 = vmatprep.subr.mxu0 %v742_v0 }
  0x53   : > { %497 = vmatpush3.xpose.msra.mxu0 %v249_v6 }
  0x54   : > { %498 = vmatprep.subr.mxu0 %v742_v0 }
  0x57   : > { %499 = vmatpush3.xpose.msra.mxu0 %v248_v7 }
  0x58   : > { %500 = vmatprep.subr.mxu0 %v742_v0 }
  0x5b   : > { %501 = vmatpush3.xpose.msra.mxu0 %v247_v8 }
  0x5c   : > { %502 = vmatprep.subr.mxu0 %v742_v0 }
  0x5f   : > { %503 = vmatpush3.xpose.msra.mxu0 %v246_v9 }
  0x60   : > { %504 = vmatprep.subr.mxu0 %v742_v0 }
  0x63   : > { %505 = vmatpush3.xpose.msra.mxu0 %v245_v10 }
  0x64   : > { %506 = vmatprep.subr.mxu0 %v742_v0 }
  0x67   : > { %507 = vmatpush3.xpose.msra.mxu0 %v244_v11 }
  0x68   : > { %508 = vmatprep.subr.mxu0 %v742_v0 }
  0x6b   : > { %509 = vmatpush3.xpose.msra.mxu0 %v243_v12 }
  0x6c   : > { %510 = vmatprep.subr.mxu0 %v742_v0 }
  0x6f   : > { %511 = vmatpush3.xpose.msra.mxu0 %v242_v13 }
  0x70   : > { %512 = vmatprep.subr.mxu0 %v742_v0 }
  0x73   : > { %513 = vmatpush3.xpose.msra.mxu0 %v241_v14 }
  0x74   : > { %514 = vmatprep.subr.mxu0 %v742_v0 }
  0x77   : > { %515 = vmatpush3.xpose.msra.mxu0 %v240_v15 }
  0x78   : > { %516 = vmatprep.subr.mxu0 %v742_v0 }
  0x7b   : > { %517 = vmatpush3.xpose.msra.mxu0 %v239_v16 }
  0x7e   : > { %519 = vmatmul.mubr.f32.vlgmr.msra.gmra.mxu0 %v238_v17 }
 0x13e   : > { %v328_v19 = vpop.f32.mrf.mxu0 }
 0x13f   : > { %v329_v20 = vadd.f32 %v464_v18, %v328_v19 }
 0x140   : > { %v520_v21 = vpop.f32.mrf.mxu0 }
 0x141   : > { %v332_v22 = vmax.f32 %v329_v20, 0.0 }
 0x143   : > { %333 = vst [vmem:[%s233_s27] sm:$0xff] %v332_v22 }
 0x144   : > { %665 = shalt.err (!%p662_p5)
}
 0x145   : > { %s666_s25 = scalar_lea.hbm %s347_s21, 128  ;;  %s670_s18 = scalar_lea.hbm %s945_s3, 256 }
 0x146   : > { %p667_p7 = scmp.ne.s32.totalorder %s347_s21, %s666_s25  ;;  %p671_p9 = scmp.lt.s32.totalorder %s347_s21, %s945_s3 }
 0x147   : > { %p672_p11 = scmp.lt.s32.totalorder %s670_s18, %s666_s25 }
 0x148   : > { %p668_p6 = pnand %p667_p7, %p852_p13 }
 0x149   : > { %p673_p12 = por %p672_p11, %p671_p9 }
 0x14a   : > { %p669_p4 = pneg %p668_p6 }
 0x14c   : > { %p674_p1 = pnand %p673_p12, %p669_p4 }
 0x14e   : > { %677 = shalt.err (!%p674_p1)
}
 0x14f   : > { %527 = dma.vmem_to_hbm [thread:$0]  (%p852_p13), %s350_s29, 128, %s347_s21, %s335_s5  }
 0x150 PF: > { %s361_s22 = sand.u32 1, %s716_s12   ;;  %p957_p8 = scmp.ne.s32.totalorder %s950_s23, 0 }
 0x151   : > { %p958_p10 = scmp.ge.s32.totalorder %s736_s17, 2  ;;  %s362_s24 = scalar_lea.sflag [#allocation4], %s361_s22 }
 0x153   : > { %p538_p0 = pnand %p958_p10, %p957_p8 }
 0x155   : > { %p539_p2 = pneg %p538_p0 }
 0x157   : > { %711 = dma.done.wait (%p539_p2), %s362_s24, 128  }
 0x158   : > { %713 = vsyncadd (%p539_p2), %s362_s24, 4294967168  ;;  %s20_s17 = sadd.s32 1, %s736_s17   ;;  %s959_s12 = smov %s720_s13 }
 0x159   : > { %p17_p3 = scmp.ge.s32.totalorder %s20_s17, 4   ;;  %s960_s13 = smov %s724_s14 }
 0x15a   : > { %s961_s14 = smov %s861_s19  ;;  %s962_s15 = smov %s732_s16 }
 0x15b   : > { %s963_s16 = smov %s965_s28  ;;  %19 = sbr.rel (!%p17_p3) target bundleno = 7 (0x7), region = 85 }
 0x160   :  { %367 = vsyncpa [#allocation3], 1 }
 0x161   :  { %369 = vsyncpa [#allocation3 + $0x1], 1 }
 0x162   :  { %370 = vsyncpa [#allocation6], 1 }
 0x163   :  { %371 = vsyncpa [#allocation4], 1 }
 0x164   :  { %373 = vsyncpa [#allocation4 + $0x1], 1 }

</bundles_post_ra>
